<compile_context>
chip_gen: v7x
topology: tpu7x:2x2x1
jax: 0.10.0
libtpu: 0.0.40
codegen_flags: <defaults>
</compile_context>

<pallas_src>
import jax
import jax.numpy as jnp
from jax.experimental import pallas as pl
from jax.experimental.pallas import tpu as pltpu


LANE_COLS = 1024                    # lane-dense last dim (multiple of 128)
SUBLANES = 8
BULK_GRANULE = SUBLANES * LANE_COLS  # 8192 elems: bulk rounded down to this
MAX_TILE_ROWS = 1024                 # 1024 x 1024 f32 = 4 MiB per tile


def fma_kernel(wb_ref, x_ref, o_ref):
    # wb_ref: SMEM (2,) f32 -> [weight, bias]
    # x_ref : VMEM (tile_rows, LANE_COLS)
    # o_ref : VMEM (tile_rows, LANE_COLS)
    w = wb_ref[0]
    b = wb_ref[1]
    o_ref[...] = (x_ref[...].astype(jnp.float32) * w + b).astype(o_ref.dtype)


def _choose_tile_rows(rows):
    """rows is a multiple of 8.  Pick a tile that (a) fits VMEM and
    (b) yields >= 2 grid tiles when possible (v7x megacore sharding)."""
    if rows <= SUBLANES:
        return rows
    half = ((rows + 1) // 2 + SUBLANES - 1) // SUBLANES * SUBLANES
    return max(SUBLANES, min(MAX_TILE_ROWS, half, rows))


def linear_forward(x, weight, bias):
    """x: (N, 1); weight: (1, 1) (PyTorch layout); bias: (1,)."""
    n, in_f = x.shape
    assert in_f == 1 and weight.shape == (1, 1) and bias.shape == (1,)

    wf = weight.reshape(()).astype(jnp.float32)
    bf = bias.reshape(()).astype(jnp.float32)
    flat = x.reshape(-1)

    # Bulk = largest multiple of 8192 elements -> free reshape to a
    # lane-dense slab whose row count is a multiple of the sublane count.
    bulk = (n // BULK_GRANULE) * BULK_GRANULE
    pieces = []

    if bulk > 0:
        rows = bulk // LANE_COLS            # multiple of 8
        slab = flat[:bulk].reshape(rows, LANE_COLS)
        tile_rows = _choose_tile_rows(rows)
        wb = jnp.stack([wf, bf])            # f32 scalars for SMEM

        out_slab = pl.pallas_call(
            fma_kernel,
            out_shape=jax.ShapeDtypeStruct((rows, LANE_COLS), x.dtype),
            grid_spec=pltpu.PrefetchScalarGridSpec(
                num_scalar_prefetch=0,
                grid=(pl.cdiv(rows, tile_rows),),
                in_specs=[
                    pl.BlockSpec(memory_space=pltpu.MemorySpace.SMEM),       # wb
                    pl.BlockSpec((tile_rows, LANE_COLS), lambda i: (i, 0)),  # slab
                ],
                out_specs=pl.BlockSpec((tile_rows, LANE_COLS), lambda i: (i, 0)),
            ),
            compiler_params=pltpu.CompilerParams(
                dimension_semantics=("parallel",),
                vmem_limit_bytes=48 << 20,
            ),
            input_output_aliases={1: 0},     # write back over the donated slab
        )(wb, slab)
        pieces.append(out_slab.reshape(-1))

    if bulk < n:
        # Tiny (< 8192 element) tail: plain JAX FMA, no padding traffic.
        tail = flat[bulk:]
        pieces.append((tail.astype(jnp.float32) * wf + bf).astype(x.dtype))

    if not pieces:                            # n == 0 guard
        return jnp.zeros((0, in_f), x.dtype)

    out = pieces[0] if len(pieces) == 1 else jnp.concatenate(pieces)
    return out.reshape(n, in_f)


if __name__ == "__main__":
    key = jax.random.PRNGKey(0)
    kx, kw, kb, kx2 = jax.random.split(key, 4)

    # PyTorch default init for Linear(1, 1): U(-1/sqrt(in), 1/sqrt(in)) = U(-1, 1).
    weight = jax.random.uniform(kw, (1, 1), jnp.float32, minval=-1.0, maxval=1.0)
    bias = jax.random.uniform(kb, (1,), jnp.float32, minval=-1.0, maxval=1.0)

    fwd = jax.jit(linear_forward)

    # Case 1: exercises the Pallas kernel (2 grid tiles) plus the JAX tail path.
    n1 = 2 * BULK_GRANULE + 10               # 16394 scalar features
    x1 = jax.random.normal(kx, (n1, 1), jnp.float32)
    out1 = jax.block_until_ready(fwd(x1, weight, bias))
    ref1 = x1 * weight[0, 0] + bias[0]
    assert out1.shape == (n1, 1)
    assert jnp.allclose(out1, ref1, atol=1e-5, rtol=1e-5)

    # Case 2: tiny batch like the original torch.randn(10) (pure tail path).
    x2 = jax.random.normal(kx2, (10, 1), jnp.float32)
    out2 = jax.block_until_ready(fwd(x2, weight, bias))
    ref2 = x2 * weight[0, 0] + bias[0]
    assert out2.shape == (10, 1)
    assert jnp.allclose(out2, ref2, atol=1e-5, rtol=1e-5)

    print("KERNEL_OK")
</pallas_src>

<mosaic_0001>
module attributes {stable_mosaic.version = 11 : i64} {
  func.func @fma_kernel(%arg0: i32, %arg1: memref<2xf32, #tpu.memory_space<smem>>, %arg2: memref<8x1024xf32, #tpu.memory_space<vmem>>, %arg3: memref<8x1024xf32, #tpu.memory_space<vmem>>) attributes {dimension_semantics = [#tpu.dimension_semantics<parallel>], iteration_bounds = array<i64: 2>, scalar_prefetch = 0 : i64, scratch_operands = 0 : i64, tpu.core_type = #tpu.core_type<tc>, window_params = [{transform_indices = @transform_0, window_bounds = array<i64: 2>}, {transform_indices = @transform_1, window_bounds = array<i64: 8, 1024>}, {transform_indices = @transform_2, window_bounds = array<i64: 8, 1024>}]} {
    %c0 = arith.constant 0 : index
    %0 = memref.load %arg1[%c0] : memref<2xf32, #tpu.memory_space<smem>>
    %c1 = arith.constant 1 : index
    %1 = memref.load %arg1[%c1] : memref<2xf32, #tpu.memory_space<smem>>
    %c0_0 = arith.constant 0 : index
    %c0_1 = arith.constant 0 : index
    %2 = vector.load %arg2[%c0_0, %c0_1] : memref<8x1024xf32, #tpu.memory_space<vmem>>, vector<8x1024xf32>
    %3 = vector.broadcast %0 : f32 to vector<8x1024xf32>
    %4 = arith.mulf %2, %3 : vector<8x1024xf32>
    %5 = vector.broadcast %1 : f32 to vector<8x1024xf32>
    %6 = arith.addf %4, %5 : vector<8x1024xf32>
    %c0_2 = arith.constant 0 : index
    %c0_3 = arith.constant 0 : index
    %7 = vector.load %arg3[%c0_2, %c0_3] : memref<8x1024xf32, #tpu.memory_space<vmem>>, vector<8x1024xf32>
    tpu.vector_store %arg3[%c0_2, %c0_3], %6 {strides = array<i32>} : memref<8x1024xf32, #tpu.memory_space<vmem>>, vector<8x1024xf32>,
    return
  }
  func.func @transform_0(%arg0: i32) -> i32 {
    %c0_i32 = arith.constant 0 : i32
    %c0_i32_0 = arith.constant 0 : i32
    return %c0_i32 : i32
  }
  func.func @transform_1(%arg0: i32) -> (i32, i32) {
    %c0_i32 = arith.constant 0 : i32
    %c0_i32_0 = arith.constant 0 : i32
    return %arg0, %c0_i32 : i32, i32
  }
  func.func @transform_2(%arg0: i32) -> (i32, i32) {
    %c0_i32 = arith.constant 0 : i32
    %c0_i32_0 = arith.constant 0 : i32
    return %arg0, %c0_i32 : i32, i32
  }
}

</mosaic_0001>

<bundles_post_ra>
// kernel: linear_forward.1
= control target key start
LH: loop header
LB: loop body
LE: loop exit
PB: predicated region body
PF: predicated region fallthrough
CT: control target
= control target key end

     0   :  { %7 = vsyncpa [#allocation3], 0  ;;  %s339_s9 = smov 0   ;;  %s370_s0 = inlined_call_operand.vmem [shape: f32[2], index: 0, kind: input, shape index: {}]   ;;  %s371_s1 = inlined_call_operand.vmem [shape: f32[16,1024], index: 1, kind: input, shape index: {}, may-alias: {1,2}]   ;;  %s372_s2 = inlined_call_operand.vmem [shape: f32[16,1024], index: 2, kind: output, shape index: {}, may-alias: {1,2}]  }
   0x1 LB: > { %s261_s10 = sadd.s32 4294967295, %s321_s9   ;;  %p263_p0 = scmp.ge.s32.totalorder %s321_s9, 1  ;;  %s321_s9 = sphi %s339_s9, %s13_s9  }
   0x2   : > { %p91_p1 = scmp.lt.s32.totalorder %s321_s9, 3  ;;  %s104_s13 = sshll.u32 %s370_s0, 4  ;;  %s105_s13 = int_to_ptr.vmem [resolvable:$true] %s104_s13 }
   0x3   : > { %p285_p3 = scmp.eq.s32.totalorder %s261_s10, 0  ;;  %s296_s15 = scalar_lea.vmem %s105_s13, 16 }
   0x4   : > { %p350_p2 = pnand %p263_p0, %p91_p1  ;;  %p297_p6 = scmp.ne.s32.totalorder %s105_s13, %s296_s15 }
   0x5   : > { %p304_p10 = scmp.lt.s32.totalorder %s105_s13, %s105_s13  ;;  %p305_p11 = scmp.lt.s32.totalorder %s296_s15, %s296_s15 }
   0x6   : > { %p281_p4 = pneg %p350_p2 }
   0x7   : > { %p306_p12 = por %p305_p11, %p304_p10 }
   0x8   : > { %p282_p5 = pnand %p285_p3, %p281_p4 }
   0xa   : > { %p298_p7 = pneg %p282_p5 }
   0xc   : > { %p299_p8 = pnand %p298_p7, %p297_p6 }
   0xe   : > { %p300_p9 = pneg %p299_p8 }
  0x10   : > { %p307_p13 = pnand %p306_p12, %p300_p9 }
  0x12   : > { %310 = shalt.err (!%p307_p13)
}
  0x13   : > { %s323_s16 = smov [#allocation2]   ;;  %125 = sbr.rel (%p350_p2) target bundleno = 44 (0x2c), region = 28 }
  0x14   : > { %284 = dma.vmem_to_smem (!%p282_p5), %s105_s13, 16, %s323_s16, [#allocation3]  }
  0x1a   : > { %316 = dma.done.wait (%p285_p3), [#allocation3], 16  }
  0x1b   : > { %318 = vsyncadd (%p285_p3), [#allocation3], 4294967280 }
  0x1c   : > { %131 = sfence }
  0x1d   : > { %p148_p0 = scmp.lt.s32.totalorder %s261_s10, 1  ;;  %s158_s17 = sld [smem:[#allocation2]] }
  0x1e   : > { %s272_s18 = sld [smem:[#allocation2 + $0x1]] }
  0x1f   : > { %s375_s10 = smov (!%p148_p0, %s261_s10), 1 }
  0x20   : > { %s275_s19 = sshll.u32 %s375_s10, 6 }
  0x21   : > { %s152_s22 = scalar_lea.vmem %s371_s1, %s275_s19  ;;  %s157_s25 = scalar_lea.vmem %s372_s2, %s275_s19 }
  0x22   : > { %v160_v0 = vld [vmem:[%s152_s22] sm:$0xff]  ;;  %v161_v1 = vld [vmem:[%s152_s22 + $0x8] sm:$0xff]  ;;  %v162_v2 = vld [vmem:[%s152_s22 + $0x10] sm:$0xff] }
  0x23   : > { %v168_v3 = vstv %s158_s17  ;;  %v163_v4 = vld [vmem:[%s152_s22 + $0x18] sm:$0xff]  ;;  %v164_v5 = vld [vmem:[%s152_s22 + $0x20] sm:$0xff]  ;;  %v165_v6 = vld [vmem:[%s152_s22 + $0x28] sm:$0xff] }
  0x24   : > { %v169_v7 = vmul.f32 %v168_v3, %v160_v0  ;;  %v170_v8 = vmul.f32 %v168_v3, %v161_v1  ;;  %v171_v9 = vmul.f32 %v168_v3, %v162_v2  ;;  %v177_v10 = vstv %s272_s18  ;;  %v166_v11 = vld [vmem:[%s152_s22 + $0x30] sm:$0xff]  ;;  %v167_v12 = vld [vmem:[%s152_s22 + $0x38] sm:$0xff] }
  0x25   : > { %v172_v13 = vmul.f32 %v168_v3, %v163_v4  ;;  %v173_v14 = vmul.f32 %v168_v3, %v164_v5  ;;  %v174_v15 = vmul.f32 %v168_v3, %v165_v6  ;;  %v175_v16 = vmul.f32 %v168_v3, %v166_v11 }
  0x26   : > { %v176_v17 = vmul.f32 %v168_v3, %v167_v12  ;;  %v178_v18 = vadd.f32 %v177_v10, %v169_v7  ;;  %v179_v19 = vadd.f32 %v177_v10, %v170_v8  ;;  %v180_v20 = vadd.f32 %v177_v10, %v171_v9 }
  0x27   : > { %v181_v21 = vadd.f32 %v177_v10, %v172_v13  ;;  %v182_v22 = vadd.f32 %v177_v10, %v173_v14  ;;  %v183_v23 = vadd.f32 %v177_v10, %v174_v15  ;;  %v184_v24 = vadd.f32 %v177_v10, %v175_v16 }
  0x28   : > { %v185_v25 = vadd.f32 %v177_v10, %v176_v17  ;;  %186 = vst [vmem:[%s157_s25] sm:$0xff] %v178_v18  ;;  %187 = vst [vmem:[%s157_s25 + $0x8] sm:$0xff] %v179_v19 }
  0x29   : > { %188 = vst [vmem:[%s157_s25 + $0x10] sm:$0xff] %v180_v20  ;;  %189 = vst [vmem:[%s157_s25 + $0x18] sm:$0xff] %v181_v21 }
  0x2a   : > { %190 = vst [vmem:[%s157_s25 + $0x20] sm:$0xff] %v182_v22  ;;  %191 = vst [vmem:[%s157_s25 + $0x28] sm:$0xff] %v183_v23 }
  0x2b   : > { %192 = vst [vmem:[%s157_s25 + $0x30] sm:$0xff] %v184_v24  ;;  %193 = vst [vmem:[%s157_s25 + $0x38] sm:$0xff] %v185_v25 }
  0x2c PF: > { %s13_s9 = sadd.s32 1, %s321_s9  }
  0x2d   : > { %p10_p1 = scmp.ge.s32.totalorder %s13_s9, 4  }
  0x2f   :  { %12 = sbr.rel (!%p10_p1) target bundleno = 1 (0x1), region = 63 }
  0x36   :  { %215 = vsyncpa [#allocation3], 1 }
  0x37   :  { %217 = vsyncpa [#allocation3 + $0x1], 1 }

</bundles_post_ra>
